<compile_context>
chip_gen: v7x
topology: tpu7x:2x2x1
jax: 0.10.0
libtpu: 0.0.40
codegen_flags: <defaults>
</compile_context>

<pallas_src>
import numpy as np
import jax
import jax.numpy as jnp
from jax.experimental import pallas as pl
from jax.experimental.pallas import tpu as pltpu


def _orthogonal(key, shape, gain=1.0, dtype=jnp.float32):
    """Deterministic orthogonal init (matches torch.nn.init.orthogonal_ semantics)."""
    rows, cols = shape
    n = max(rows, cols)
    a = jax.random.normal(key, (n, n), dtype=jnp.float32)
    q, r = jnp.linalg.qr(a)
    d = jnp.diag(r)
    # make the decomposition unique; guard sign(0) -> 1 so no column is zeroed
    q = q * jnp.where(d == 0, 1.0, jnp.sign(d))[None, :]
    return (gain * q[:rows, :cols]).astype(dtype)


def critic_head_kernel(x_ref, w1_ref, b1_ref, w2_ref, b2_ref, o_ref):
    # x: (TB, D), w1: (D, H), b1: (1, H), w2: (1, H) lane-dense, b2: (1, 1)
    # o: (1, TB) lane-dense (batch along the lane axis)
    h = jnp.tanh(
        jnp.dot(x_ref[...], w1_ref[...], preferred_element_type=jnp.float32)
        + b1_ref[...]
    )
    # Second (hidden -> 1) projection, contracted straight into a lane-dense
    # (1, TB) row so the store is a full-lane vst instead of masked vst.msk.
    v = jnp.einsum(
        "oh,bh->ob", w2_ref[...], h, preferred_element_type=jnp.float32
    )
    o_ref[...] = v + b2_ref[...]


def critic_head_forward(
    obs, w1, b1, w2, b2, *, max_block_rows=1024, target_block_bytes=2 << 20
):
    """obs: (B, C, H, W) float32 (NCHW, flattened row-major like nn.Flatten).

    Returns value estimates of shape (B,)  == forward(...).squeeze(-1).
    """
    B = obs.shape[0]
    x2d = obs.reshape(B, -1)  # nn.Flatten on NCHW
    D = x2d.shape[1]
    Hd = w1.shape[1]
    itemsize = jnp.dtype(x2d.dtype).itemsize

    # Lane-dense parameter layouts for the kernel.
    w2_row = w2.reshape(1, Hd)
    b1_row = b1.reshape(1, Hd)
    b2_2d = b2.reshape(1, 1)

    # Row tile: ~2 MiB of x per block (measured ~85% of HBM roofline at 512
    # rows for D=1024 f32), multiple of 128 so multi-tile output blocks stay
    # lane-aligned.  Double-buffered this stays well under every generation's
    # default scoped VMEM (v5e 16 MiB, v7x 32 MiB).
    tb = max(128, min(int(max_block_rows), target_block_bytes // max(1, D * itemsize)))
    tb = (tb // 128) * 128

    b_sub = ((B + 7) // 8) * 8  # sublane multiple
    if b_sub <= tb:
        tb = b_sub  # single tile: block == full (padded) array dims

    b_pad = ((B + tb - 1) // tb) * tb
    if b_pad != B:
        x2d = jnp.pad(x2d, ((0, b_pad - B), (0, 0)))

    grid = (b_pad // tb,)

    out = pl.pallas_call(
        critic_head_kernel,
        out_shape=jax.ShapeDtypeStruct((1, b_pad), jnp.float32),
        grid_spec=pltpu.PrefetchScalarGridSpec(
            num_scalar_prefetch=0,
            grid=grid,
            in_specs=[
                pl.BlockSpec((tb, D), lambda i: (i, 0)),   # x: streamed per tile
                pl.BlockSpec((D, Hd), lambda i: (0, 0)),   # w1: resident
                pl.BlockSpec((1, Hd), lambda i: (0, 0)),   # b1
                pl.BlockSpec((1, Hd), lambda i: (0, 0)),   # w2 (lane-dense row)
                pl.BlockSpec((1, 1), lambda i: (0, 0)),    # b2
            ],
            out_specs=pl.BlockSpec((1, tb), lambda i: (0, i)),  # lane-dense out
        ),
        compiler_params=pltpu.CompilerParams(
            dimension_semantics=("parallel",),
        ),
        cost_estimate=pl.CostEstimate(
            flops=2 * b_pad * D * Hd + 2 * b_pad * Hd,
            transcendentals=b_pad * Hd,
            bytes_accessed=itemsize * (b_pad * D + D * Hd + 3 * Hd + 1 + b_pad),
        ),
    )(x2d, w1, b1_row, w2_row, b2_2d)

    # v.squeeze(-1) in the PyTorch forward (drop batch padding).
    return out[0, :B]


if __name__ == "__main__":
    # Module configuration mirroring CriticHead(in_dim=(4,16,16), hidden_sizes=(32,))
    B, C, H, W = 2, 4, 16, 16
    in_channels = C * H * W  # 1024 == np.prod(in_dim)
    hidden = 32

    key = jax.random.PRNGKey(0)
    k_obs, k_w1, k_w2, k_obs2 = jax.random.split(key, 4)

    # Orthogonal init: hidden layer gain sqrt(2), final layer gain 1.0, zero biases
    # (matches mlp(..., init_layers_orthogonal=True, final_layer_gain=1.0)).
    w1 = _orthogonal(k_w1, (in_channels, hidden), gain=float(np.sqrt(2.0)))
    b1 = jnp.zeros((1, hidden), dtype=jnp.float32)
    w2 = _orthogonal(k_w2, (hidden, 1), gain=1.0)
    b2 = jnp.zeros((1, 1), dtype=jnp.float32)

    obs = jax.random.normal(k_obs, (B, C, H, W), dtype=jnp.float32)

    # Small demo batch (single-tile / launch-overhead path).
    v = jax.block_until_ready(critic_head_forward(obs, w1, b1, w2, b2))
    x2d = obs.reshape(B, -1)
    ref = (jnp.tanh(x2d @ w1 + b1) @ w2 + b2)[:, 0]
    assert v.shape == (B,)
    np.testing.assert_allclose(np.asarray(v), np.asarray(ref), rtol=1e-5, atol=1e-5)

    # Ragged, multi-tile batch (exercises the pipelined grid + padding path).
    B2 = 300
    obs2 = jax.random.normal(k_obs2, (B2, C, H, W), dtype=jnp.float32)
    v2 = jax.block_until_ready(
        critic_head_forward(obs2, w1, b1, w2, b2, max_block_rows=128)
    )
    ref2 = (jnp.tanh(obs2.reshape(B2, -1) @ w1 + b1) @ w2 + b2)[:, 0]
    assert v2.shape == (B2,)
    np.testing.assert_allclose(np.asarray(v2), np.asarray(ref2), rtol=1e-5, atol=1e-5)

    print("KERNEL_OK")
</pallas_src>

<mosaic_0001>
module attributes {stable_mosaic.version = 11 : i64} {
  func.func @critic_head_kernel(%arg0: i32, %arg1: memref<8x1024xf32, #tpu.memory_space<vmem>>, %arg2: memref<1024x32xf32, #tpu.memory_space<vmem>>, %arg3: memref<1x32xf32, #tpu.memory_space<vmem>>, %arg4: memref<1x32xf32, #tpu.memory_space<vmem>>, %arg5: memref<1x1xf32, #tpu.memory_space<vmem>>, %arg6: memref<1x8xf32, #tpu.memory_space<vmem>>) attributes {dimension_semantics = [#tpu.dimension_semantics<parallel>], iteration_bounds = array<i64: 1>, scalar_prefetch = 0 : i64, scratch_operands = 0 : i64, tpu.core_type = #tpu.core_type<tc>, window_params = [{transform_indices = @transform_0, window_bounds = array<i64: 8, 1024>}, {pipeline_mode = #tpu.pipeline_mode<synchronous>, transform_indices = @transform_1, window_bounds = array<i64: 1024, 32>}, {pipeline_mode = #tpu.pipeline_mode<synchronous>, transform_indices = @transform_2, window_bounds = array<i64: 1, 32>}, {pipeline_mode = #tpu.pipeline_mode<synchronous>, transform_indices = @transform_3, window_bounds = array<i64: 1, 32>}, {pipeline_mode = #tpu.pipeline_mode<synchronous>, transform_indices = @transform_4, window_bounds = array<i64: 1, 1>}, {transform_indices = @transform_5, window_bounds = array<i64: 1, 8>}]} {
    %c0 = arith.constant 0 : index
    %c0_0 = arith.constant 0 : index
    %0 = vector.load %arg1[%c0, %c0_0] : memref<8x1024xf32, #tpu.memory_space<vmem>>, vector<8x1024xf32>
    %c0_1 = arith.constant 0 : index
    %c0_2 = arith.constant 0 : index
    %1 = vector.load %arg2[%c0_1, %c0_2] : memref<1024x32xf32, #tpu.memory_space<vmem>>, vector<1024x32xf32>
    %cst = arith.constant dense<0.000000e+00> : vector<8x32xf32>
    %2 = tpu.matmul %0, %1, %cst {dimension_numbers = #tpu.dot_dimension_numbers<[1], [0], [0], [1], [0, 0, 1, 1], [], []>} : vector<8x1024xf32>, vector<1024x32xf32>, vector<8x32xf32> -> vector<8x32xf32>
    %c0_3 = arith.constant 0 : index
    %c0_4 = arith.constant 0 : index
    %3 = vector.load %arg3[%c0_3, %c0_4] : memref<1x32xf32, #tpu.memory_space<vmem>>, vector<1x32xf32>
    %4 = vector.broadcast %3 : vector<1x32xf32> to vector<8x32xf32>
    %5 = arith.addf %2, %4 : vector<8x32xf32>
    %6 = math.tanh %5 : vector<8x32xf32>
    %c0_5 = arith.constant 0 : index
    %c0_6 = arith.constant 0 : index
    %7 = vector.load %arg4[%c0_5, %c0_6] : memref<1x32xf32, #tpu.memory_space<vmem>>, vector<1x32xf32>
    "tpu.trace_start"() <{level = 10 : i32, message = "oh,bh->ob"}> : () -> ()
    %cst_7 = arith.constant dense<0.000000e+00> : vector<1x8xf32>
    %8 = tpu.matmul %7, %6, %cst_7 {dimension_numbers = #tpu.dot_dimension_numbers<[1], [1], [0], [0], [0, 0, 1, 0], [], []>} : vector<1x32xf32>, vector<8x32xf32>, vector<1x8xf32> -> vector<1x8xf32>
    "tpu.trace_stop"() : () -> ()
    %c0_8 = arith.constant 0 : index
    %c0_9 = arith.constant 0 : index
    %9 = vector.load %arg5[%c0_8, %c0_9] : memref<1x1xf32, #tpu.memory_space<vmem>>, vector<1x1xf32>
    %10 = vector.broadcast %9 : vector<1x1xf32> to vector<1x8xf32>
    %11 = arith.addf %8, %10 : vector<1x8xf32>
    %c0_10 = arith.constant 0 : index
    %c0_11 = arith.constant 0 : index
    %12 = vector.load %arg6[%c0_10, %c0_11] : memref<1x8xf32, #tpu.memory_space<vmem>>, vector<1x8xf32>
    tpu.vector_store %arg6[%c0_10, %c0_11], %11 {strides = array<i32>} : memref<1x8xf32, #tpu.memory_space<vmem>>, vector<1x8xf32>,
    return
  }
  func.func @transform_0(%arg0: i32) -> (i32, i32) {
    %c0_i32 = arith.constant 0 : i32
    %c0_i32_0 = arith.constant 0 : i32
    return %arg0, %c0_i32 : i32, i32
  }
  func.func @transform_1(%arg0: i32) -> (i32, i32) {
    %c0_i32 = arith.constant 0 : i32
    %c0_i32_0 = arith.constant 0 : i32
    %c0_i32_1 = arith.constant 0 : i32
    return %c0_i32, %c0_i32_0 : i32, i32
  }
  func.func @transform_2(%arg0: i32) -> (i32, i32) {
    %c0_i32 = arith.constant 0 : i32
    %c0_i32_0 = arith.constant 0 : i32
    %c0_i32_1 = arith.constant 0 : i32
    return %c0_i32, %c0_i32_0 : i32, i32
  }
  func.func @transform_3(%arg0: i32) -> (i32, i32) {
    %c0_i32 = arith.constant 0 : i32
    %c0_i32_0 = arith.constant 0 : i32
    %c0_i32_1 = arith.constant 0 : i32
    return %c0_i32, %c0_i32_0 : i32, i32
  }
  func.func @transform_4(%arg0: i32) -> (i32, i32) {
    %c0_i32 = arith.constant 0 : i32
    %c0_i32_0 = arith.constant 0 : i32
    %c0_i32_1 = arith.constant 0 : i32
    return %c0_i32, %c0_i32_0 : i32, i32
  }
  func.func @transform_5(%arg0: i32) -> (i32, i32) {
    %c0_i32 = arith.constant 0 : i32
    %c0_i32_0 = arith.constant 0 : i32
    return %c0_i32, %arg0 : i32, i32
  }
}

</mosaic_0001>

<bundles_post_ra>
// kernel: tpu_custom_call.1
= control target key start
LH: loop header
LB: loop body
LE: loop exit
PB: predicated region body
PF: predicated region fallthrough
CT: control target
= control target key end

     0   :  { %s1323_s0 = inlined_call_operand.vmem [shape: f32[8,1024], index: 0, kind: input, shape index: {}]   ;;  %s1324_s1 = inlined_call_operand.vmem [shape: f32[1024,32], index: 1, kind: input, shape index: {}]   ;;  %s1325_s2 = inlined_call_operand.vmem [shape: f32[1,32], index: 2, kind: input, shape index: {}]   ;;  %s1326_s3 = inlined_call_operand.vmem [shape: f32[1,32], index: 3, kind: input, shape index: {}]   ;;  %s1327_s4 = inlined_call_operand.<no memory space> [shape: f32[1,1], index: 4, kind: input, shape index: {}]   ;;  %s1328_s5 = inlined_call_operand.hbm [shape: f32[1,8], index: 5, kind: output, shape index: {}]  }
   0x1   :  { %v10_v0 = vstv %s1327_s4 }
   0x2   :  { %11 = vst [vmem:[#allocation2] sm:$0x1] %v10_v0 }
   0x3   :  { %v47_v1 = vld [vmem:[%s1324_s1 + $0x80] sm:$0xff]  ;;  %v48_v2 = vld [vmem:[%s1324_s1 + $0x88] sm:$0xff]  ;;  %v49_v12 = vld [vmem:[%s1324_s1 + $0x90] sm:$0xff] }
   0x4   :  { %v31_v3 = vld [vmem:[%s1324_s1] sm:$0xff]  ;;  %v701_v4 = vpack.c.bf16 %v48_v2, %v47_v1  ;;  %v32_v5 = vld [vmem:[%s1324_s1 + $0x8] sm:$0xff]  ;;  %v50_v14 = vld [vmem:[%s1324_s1 + $0x98] sm:$0xff] }
   0x5   :  { %v79_v6 = vld [vmem:[%s1324_s1 + $0x180] sm:$0xff]  ;;  %v80_v7 = vld [vmem:[%s1324_s1 + $0x188] sm:$0xff]  ;;  %v703_v8 = vpack.c.bf16 %v32_v5, %v31_v3  ;;  %v33_v15 = vld [vmem:[%s1324_s1 + $0x10] sm:$0xff]  ;;  %v705_v17 = vpack.c.bf16 %v50_v14, %v49_v12 }
   0x6   :  { %v733_v9 = vpack.c.bf16 %v80_v7, %v79_v6  ;;  %v63_v10 = vld [vmem:[%s1324_s1 + $0x100] sm:$0xff]  ;;  %v64_v11 = vld [vmem:[%s1324_s1 + $0x108] sm:$0xff]  ;;  %702 = vmatprep.subr.bf16.mxu0 %v701_v4  ;;  %v34_v16 = vld [vmem:[%s1324_s1 + $0x18] sm:$0xff] }
   0x7   :  { %v735_v13 = vpack.c.bf16 %v64_v11, %v63_v10  ;;  %704 = vmatpush3.bf16.msra.mxu0 %v703_v8  ;;  %v707_v18 = vpack.c.bf16 %v34_v16, %v33_v15  ;;  %v81_v19 = vld [vmem:[%s1324_s1 + $0x190] sm:$0xff]  ;;  %v82_v20 = vld [vmem:[%s1324_s1 + $0x198] sm:$0xff]  ;;  %v51_v24 = vld [vmem:[%s1324_s1 + $0xa0] sm:$0xff] }
   0x8   :  { %734 = vmatprep.subr.bf16.mxu1 %v733_v9  ;;  %v65_v21 = vld [vmem:[%s1324_s1 + $0x110] sm:$0xff]  ;;  %v737_v22 = vpack.c.bf16 %v82_v20, %v81_v19  ;;  %v66_v23 = vld [vmem:[%s1324_s1 + $0x118] sm:$0xff]  ;;  %v52_v25 = vld [vmem:[%s1324_s1 + $0xa8] sm:$0xff]  ;;  %706 = vmatprep.subr.bf16.mxu0 %v705_v17 }
   0x9   :  { %736 = vmatpush3.bf16.msra.mxu1 %v735_v13  ;;  %v739_v26 = vpack.c.bf16 %v66_v23, %v65_v21  ;;  %v709_v27 = vpack.c.bf16 %v52_v25, %v51_v24  ;;  %v35_v28 = vld [vmem:[%s1324_s1 + $0x20] sm:$0xff]  ;;  %v36_v29 = vld [vmem:[%s1324_s1 + $0x28] sm:$0xff]  ;;  %v53_v36 = vld [vmem:[%s1324_s1 + $0xb0] sm:$0xff] }
   0xa   :  { %v83_v30 = vld [vmem:[%s1324_s1 + $0x1a0] sm:$0xff]  ;;  %738 = vmatprep.subr.bf16.mxu1 %v737_v22  ;;  %v84_v31 = vld [vmem:[%s1324_s1 + $0x1a8] sm:$0xff]  ;;  %v711_v34 = vpack.c.bf16 %v36_v29, %v35_v28  ;;  %v54_v37 = vld [vmem:[%s1324_s1 + $0xb8] sm:$0xff] }
   0xb   :  { %v67_v32 = vld [vmem:[%s1324_s1 + $0x120] sm:$0xff]  ;;  %v68_v33 = vld [vmem:[%s1324_s1 + $0x128] sm:$0xff]  ;;  %708 = vmatpush3.bf16.msra.mxu0 %v707_v18  ;;  %v741_v35 = vpack.c.bf16 %v84_v31, %v83_v30  ;;  %v37_v38 = vld [vmem:[%s1324_s1 + $0x30] sm:$0xff]  ;;  %v713_v40 = vpack.c.bf16 %v54_v37, %v53_v36 }
   0xc   :  { %710 = vmatprep.subr.bf16.mxu0 %v709_v27  ;;  %v743_v39 = vpack.c.bf16 %v68_v33, %v67_v32  ;;  %v38_v41 = vld [vmem:[%s1324_s1 + $0x38] sm:$0xff]  ;;  %v85_v42 = vld [vmem:[%s1324_s1 + $0x1b0] sm:$0xff]  ;;  %v55_v47 = vld [vmem:[%s1324_s1 + $0xc0] sm:$0xff] }
   0xd   :  { %740 = vmatpush3.bf16.msra.mxu1 %v739_v26  ;;  %v86_v43 = vld [vmem:[%s1324_s1 + $0x1b8] sm:$0xff]  ;;  %v69_v45 = vld [vmem:[%s1324_s1 + $0x130] sm:$0xff]  ;;  %v56_v48 = vld [vmem:[%s1324_s1 + $0xc8] sm:$0xff]  ;;  %v715_v49 = vpack.c.bf16 %v38_v41, %v37_v38 }
   0xe   :  { %742 = vmatprep.subr.bf16.mxu1 %v741_v35  ;;  %v745_v44 = vpack.c.bf16 %v86_v43, %v85_v42  ;;  %v70_v46 = vld [vmem:[%s1324_s1 + $0x138] sm:$0xff]  ;;  %v87_v50 = vld [vmem:[%s1324_s1 + $0x1c0] sm:$0xff]  ;;  %v88_v51 = vld [vmem:[%s1324_s1 + $0x1c8] sm:$0xff]  ;;  %v717_v53 = vpack.c.bf16 %v56_v48, %v55_v47 }
   0xf   :  { %712 = vmatpush3.bf16.msra.mxu0 %v711_v34  ;;  %v747_v52 = vpack.c.bf16 %v70_v46, %v69_v45  ;;  %v39_v54 = vld [vmem:[%s1324_s1 + $0x40] sm:$0xff]  ;;  %v40_v55 = vld [vmem:[%s1324_s1 + $0x48] sm:$0xff]  ;;  %v749_v57 = vpack.c.bf16 %v88_v51, %v87_v50  ;;  %v57_v59 = vld [vmem:[%s1324_s1 + $0xd0] sm:$0xff] }
  0x10   :  { %714 = vmatprep.subr.bf16.mxu0 %v713_v40  ;;  %v71_v56 = vld [vmem:[%s1324_s1 + $0x140] sm:$0xff]  ;;  %v72_v58 = vld [vmem:[%s1324_s1 + $0x148] sm:$0xff]  ;;  %v58_v60 = vld [vmem:[%s1324_s1 + $0xd8] sm:$0xff]  ;;  %v719_v63 = vpack.c.bf16 %v40_v55, %v39_v54 }
  0x11   :  { %744 = vmatpush3.bf16.msra.mxu1 %v743_v39  ;;  %v89_v61 = vld [vmem:[%s1324_s1 + $0x1d0] sm:$0xff]  ;;  %v90_v62 = vld [vmem:[%s1324_s1 + $0x1d8] sm:$0xff]  ;;  %v751_v0 = vpack.c.bf16 %v72_v58, %v71_v56  ;;  %v721_v1 = vpack.c.bf16 %v58_v60, %v57_v59  ;;  %v59_v7 = vld [vmem:[%s1324_s1 + $0xe0] sm:$0xff] }
  0x12   :  { %746 = vmatprep.subr.bf16.mxu1 %v745_v44  ;;  %v41_v2 = vld [vmem:[%s1324_s1 + $0x50] sm:$0xff]  ;;  %v42_v3 = vld [vmem:[%s1324_s1 + $0x58] sm:$0xff]  ;;  %v753_v5 = vpack.c.bf16 %v90_v62, %v89_v61  ;;  %v60_v8 = vld [vmem:[%s1324_s1 + $0xe8] sm:$0xff] }
  0x13   :  { %716 = vmatpush3.bf16.msra.mxu0 %v715_v49  ;;  %v73_v4 = vld [vmem:[%s1324_s1 + $0x150] sm:$0xff]  ;;  %v74_v6 = vld [vmem:[%s1324_s1 + $0x158] sm:$0xff]  ;;  %v91_v9 = vld [vmem:[%s1324_s1 + $0x1e0] sm:$0xff]  ;;  %v723_v11 = vpack.c.bf16 %v42_v3, %v41_v2  ;;  %v725_v15 = vpack.c.bf16 %v60_v8, %v59_v7 }
  0x14   :  { %718 = vmatprep.subr.bf16.mxu0 %v717_v53  ;;  %v92_v10 = vld [vmem:[%s1324_s1 + $0x1e8] sm:$0xff]  ;;  %v43_v12 = vld [vmem:[%s1324_s1 + $0x60] sm:$0xff]  ;;  %v755_v14 = vpack.c.bf16 %v74_v6, %v73_v4  ;;  %v61_v20 = vld [vmem:[%s1324_s1 + $0xf0] sm:$0xff] }
  0x15   :  { %748 = vmatpush3.bf16.msra.mxu1 %v747_v52  ;;  %v44_v13 = vld [vmem:[%s1324_s1 + $0x68] sm:$0xff]  ;;  %v75_v16 = vld [vmem:[%s1324_s1 + $0x160] sm:$0xff]  ;;  %v757_v19 = vpack.c.bf16 %v92_v10, %v91_v9  ;;  %v62_v21 = vld [vmem:[%s1324_s1 + $0xf8] sm:$0xff] }
  0x16   :  { %750 = vmatprep.subr.bf16.mxu1 %v749_v57  ;;  %v76_v17 = vld [vmem:[%s1324_s1 + $0x168] sm:$0xff]  ;;  %v26_v22 = vld [vmem:[%s1323_s0 + $0x18] sm:$0xff]  ;;  %v93_v23 = vld [vmem:[%s1324_s1 + $0x1f0] sm:$0xff]  ;;  %v727_v25 = vpack.c.bf16 %v44_v13, %v43_v12  ;;  %v729_v27 = vpack.c.bf16 %v62_v21, %v61_v20 }
  0x17   :  { %720 = vmatpush3.bf16.msra.mxu0 %v719_v63  ;;  %v24_v18 = vld [vmem:[%s1323_s0 + $0x8] sm:$0xff]  ;;  %v94_v24 = vld [vmem:[%s1324_s1 + $0x1f8] sm:$0xff]  ;;  %300 = vmatprep.mubr.f32.mxu1 %v26_v22  ;;  %v759_v26 = vpack.c.bf16 %v76_v17, %v75_v16  ;;  %v45_v28 = vld [vmem:[%s1324_s1 + $0x70] sm:$0xff] }
  0x18   :  { %722 = vmatprep.subr.bf16.mxu0 %v721_v1  ;;  %230 = vmatprep.mubr.f32.mxu0 %v24_v18  ;;  %v46_v29 = vld [vmem:[%s1324_s1 + $0x78] sm:$0xff]  ;;  %v77_v30 = vld [vmem:[%s1324_s1 + $0x170] sm:$0xff]  ;;  %v761_v31 = vpack.c.bf16 %v94_v24, %v93_v23  ;;  %v111_v33 = vld [vmem:[%s1324_s1 + $0x280] sm:$0xff] }
  0x19   :  { %752 = vmatpush3.bf16.msra.mxu1 %v751_v0  ;;  %v78_v32 = vld [vmem:[%s1324_s1 + $0x178] sm:$0xff]  ;;  %v112_v34 = vld [vmem:[%s1324_s1 + $0x288] sm:$0xff]  ;;  %v143_v35 = vld [vmem:[%s1324_s1 + $0x380] sm:$0xff]  ;;  %v731_v37 = vpack.c.bf16 %v46_v29, %v45_v28 }
  0x1a   :  { %754 = vmatprep.subr.bf16.mxu1 %v753_v5  ;;  %v144_v36 = vld [vmem:[%s1324_s1 + $0x388] sm:$0xff]  ;;  %v763_v38 = vpack.c.bf16 %v78_v32, %v77_v30  ;;  %v765_v39 = vpack.c.bf16 %v112_v34, %v111_v33  ;;  %v95_v40 = vld [vmem:[%s1324_s1 + $0x200] sm:$0xff]  ;;  %v113_v45 = vld [vmem:[%s1324_s1 + $0x290] sm:$0xff] }
  0x1b   :  { %724 = vmatpush3.bf16.msra.mxu0 %v723_v11  ;;  %v96_v41 = vld [vmem:[%s1324_s1 + $0x208] sm:$0xff]  ;;  %v127_v42 = vld [vmem:[%s1324_s1 + $0x300] sm:$0xff]  ;;  %v797_v43 = vpack.c.bf16 %v144_v36, %v143_v35  ;;  %v114_v46 = vld [vmem:[%s1324_s1 + $0x298] sm:$0xff] }
  0x1c   :  { %726 = vmatprep.subr.bf16.mxu0 %v725_v15  ;;  %v128_v44 = vld [vmem:[%s1324_s1 + $0x308] sm:$0xff]  ;;  %v145_v47 = vld [vmem:[%s1324_s1 + $0x390] sm:$0xff]  ;;  %v146_v48 = vld [vmem:[%s1324_s1 + $0x398] sm:$0xff]  ;;  %v767_v50 = vpack.c.bf16 %v96_v41, %v95_v40  ;;  %v769_v53 = vpack.c.bf16 %v114_v46, %v113_v45 }
  0x1d   :  { %756 = vmatpush3.bf16.msra.mxu1 %v755_v14  ;;  %v23_v49 = vld [vmem:[%s1323_s0] sm:$0xff]  ;;  %v25_v51 = vld [vmem:[%s1323_s0 + $0x10] sm:$0xff]  ;;  %v799_v52 = vpack.c.bf16 %v128_v44, %v127_v42  ;;  %v98_v55 = vld [vmem:[%s1324_s1 + $0x218] sm:$0xff]  ;;  %v801_v57 = vpack.c.bf16 %v146_v48, %v145_v47 }
  0x1e   :  { %758 = vmatprep.subr.bf16.mxu1 %v757_v19  ;;  %v97_v54 = vld [vmem:[%s1324_s1 + $0x210] sm:$0xff]  ;;  %v130_v58 = vld [vmem:[%s1324_s1 + $0x318] sm:$0xff]  ;;  %v115_v59 = vld [vmem:[%s1324_s1 + $0x2a0] sm:$0xff] }
  0x1f   :  { %728 = vmatpush3.bf16.msra.mxu0 %v727_v25  ;;  %v129_v56 = vld [vmem:[%s1324_s1 + $0x310] sm:$0xff]  ;;  %v116_v60 = vld [vmem:[%s1324_s1 + $0x2a8] sm:$0xff]  ;;  %v147_v61 = vld [vmem:[%s1324_s1 + $0x3a0] sm:$0xff]  ;;  %v771_v63 = vpack.c.bf16 %v98_v55, %v97_v54 }
  0x20   :  { %730 = vmatprep.subr.bf16.mxu0 %v729_v27  ;;  %v148_v62 = vld [vmem:[%s1324_s1 + $0x3a8] sm:$0xff]  ;;  %v803_v0 = vpack.c.bf16 %v130_v58, %v129_v56  ;;  %v773_v1 = vpack.c.bf16 %v116_v60, %v115_v59  ;;  %v99_v2 = vld [vmem:[%s1324_s1 + $0x220] sm:$0xff]  ;;  %v117_v7 = vld [vmem:[%s1324_s1 + $0x2b0] sm:$0xff] }
  0x21   :  { %760 = vmatpush3.bf16.msra.mxu1 %v759_v26  ;;  %v100_v3 = vld [vmem:[%s1324_s1 + $0x228] sm:$0xff]  ;;  %v131_v4 = vld [vmem:[%s1324_s1 + $0x320] sm:$0xff]  ;;  %v805_v5 = vpack.c.bf16 %v148_v62, %v147_v61  ;;  %v118_v8 = vld [vmem:[%s1324_s1 + $0x2b8] sm:$0xff] }
  0x22   :  { %762 = vmatprep.subr.bf16.mxu1 %v761_v31  ;;  %v132_v6 = vld [vmem:[%s1324_s1 + $0x328] sm:$0xff]  ;;  %v149_v9 = vld [vmem:[%s1324_s1 + $0x3b0] sm:$0xff]  ;;  %v150_v10 = vld [vmem:[%s1324_s1 + $0x3b8] sm:$0xff]  ;;  %v775_v11 = vpack.c.bf16 %v100_v3, %v99_v2  ;;  %v777_v13 = vpack.c.bf16 %v118_v8, %v117_v7 }
  0x23   :  { %732 = vmatpush3.bf16.msra.mxu0 %v731_v37  ;;  %v807_v12 = vpack.c.bf16 %v132_v6, %v131_v4  ;;  %v101_v14 = vld [vmem:[%s1324_s1 + $0x230] sm:$0xff]  ;;  %v102_v15 = vld [vmem:[%s1324_s1 + $0x238] sm:$0xff]  ;;  %v809_v17 = vpack.c.bf16 %v150_v10, %v149_v9  ;;  %v119_v19 = vld [vmem:[%s1324_s1 + $0x2c0] sm:$0xff] }
  0x24   :  { %766 = vmatprep.subr.bf16.mxu0 %v765_v39  ;;  %v133_v16 = vld [vmem:[%s1324_s1 + $0x330] sm:$0xff]  ;;  %v134_v18 = vld [vmem:[%s1324_s1 + $0x338] sm:$0xff]  ;;  %v120_v20 = vld [vmem:[%s1324_s1 + $0x2c8] sm:$0xff]  ;;  %v779_v23 = vpack.c.bf16 %v102_v15, %v101_v14 }
  0x25   :  { %764 = vmatpush3.bf16.msra.mxu1 %v763_v38  ;;  %v151_v21 = vld [vmem:[%s1324_s1 + $0x3c0] sm:$0xff]  ;;  %v152_v22 = vld [vmem:[%s1324_s1 + $0x3c8] sm:$0xff]  ;;  %v30_v26 = vld [vmem:[%s1323_s0 + $0x38] sm:$0xff]  ;;  %v811_v27 = vpack.c.bf16 %v134_v18, %v133_v16  ;;  %v781_v28 = vpack.c.bf16 %v120_v20, %v119_v19 }
  0x26   :  { %798 = vmatprep.subr.bf16.mxu1 %v797_v43  ;;  %231 = vmatmul.mubr.f32.vlgmr.msra.gmra.mrb[0].mxu0 %v23_v49  ;;  %v103_v24 = vld [vmem:[%s1324_s1 + $0x240] sm:$0xff]  ;;  %v28_v25 = vld [vmem:[%s1323_s0 + $0x28] sm:$0xff] }
  0x27   :  { %768 = vmatpush3.bf16.msra.mxu0 %v767_v50  ;;  %v104_v29 = vld [vmem:[%s1324_s1 + $0x248] sm:$0xff]  ;;  %v135_v30 = vld [vmem:[%s1324_s1 + $0x340] sm:$0xff] }
  0x28   :  { %301 = vmatmul.mubr.f32.vlgmr.msra.gmra.mrb[0].mxu1 %v25_v51  ;;  %770 = vmatprep.subr.bf16.mxu0 %v769_v53 }
  0x29   :  { %800 = vmatpush3.bf16.msra.mxu1 %v799_v52 }
  0x2a   :  { %802 = vmatprep.subr.bf16.mxu1 %v801_v57 }
  0x2b   :  { %772 = vmatpush3.bf16.msra.mxu0 %v771_v63 }
  0x2c   :  { %774 = vmatprep.subr.bf16.mxu0 %v773_v1 }
  0x2d   :  { %804 = vmatpush3.bf16.msra.mxu1 %v803_v0 }
  0x2e   :  { %806 = vmatprep.subr.bf16.mxu1 %v805_v5 }
  0x2f   :  { %776 = vmatpush3.bf16.msra.mxu0 %v775_v11 }
  0x30   :  { %778 = vmatprep.subr.bf16.mxu0 %v777_v13 }
  0x31   :  { %808 = vmatpush3.bf16.msra.mxu1 %v807_v12 }
  0x32   :  { %12 = vsyncpa [#allocation4], 0  ;;  %810 = vmatprep.subr.bf16.mxu1 %v809_v17  ;;  %v813_v31 = vpack.c.bf16 %v152_v22, %v151_v21  ;;  %v136_v32 = vld [vmem:[%s1324_s1 + $0x348] sm:$0xff]  ;;  %v121_v33 = vld [vmem:[%s1324_s1 + $0x2d0] sm:$0xff]  ;;  %370 = vmatprep.mubr.f32.mxu0 %v28_v25  ;;  %v783_v37 = vpack.c.bf16 %v104_v29, %v103_v24  ;;  %v860_v9 = vmov 0.0   ;;  %vm861_vm0 = vmmov 0  }
  0x33   :  { %v122_v34 = vld [vmem:[%s1324_s1 + $0x2d8] sm:$0xff]  ;;  %v153_v35 = vld [vmem:[%s1324_s1 + $0x3d0] sm:$0xff]  ;;  %440 = vmatprep.mubr.f32.mxu1 %v30_v26  ;;  %780 = vmatpush3.bf16.msra.mxu0 %v779_v23  ;;  %v815_v38 = vpack.c.bf16 %v136_v32, %v135_v30  ;;  %v123_v45 = vld [vmem:[%s1324_s1 + $0x2e0] sm:$0xff]  ;;  %v862_v11 = vmov 0   ;;  %vm458_vm1 = vcmask 261120   ;;  %s863_s7 = smov [#allocation3]  }
  0x34   :  { %v154_v36 = vld [vmem:[%s1324_s1 + $0x3d8] sm:$0xff]  ;;  %782 = vmatprep.subr.bf16.mxu0 %v781_v28  ;;  %v785_v39 = vpack.c.bf16 %v122_v34, %v121_v33  ;;  %v105_v40 = vld [vmem:[%s1324_s1 + $0x250] sm:$0xff]  ;;  %v124_v46 = vld [vmem:[%s1324_s1 + $0x2e8] sm:$0xff]  ;;  %833 = vset.pattern.permute.xlu0 %v862_v11  ;;  %s543_s8 = sshll.u32 %s863_s7, 4  ;;  %vm535_vm2 = vcmask 57344   ;;  %s544_s8 = int_to_ptr.vmem [resolvable:$true] %s543_s8 }
  0x35   :  { %812 = vmatpush3.bf16.msra.mxu1 %v811_v27  ;;  %v106_v41 = vld [vmem:[%s1324_s1 + $0x258] sm:$0xff]  ;;  %v137_v42 = vld [vmem:[%s1324_s1 + $0x350] sm:$0xff]  ;;  %v817_v43 = vpack.c.bf16 %v154_v36, %v153_v35  ;;  %v155_v47 = vld [vmem:[%s1324_s1 + $0x3e0] sm:$0xff]  ;;  %v789_v51 = vpack.c.bf16 %v124_v46, %v123_v45  ;;  %s836_s9 = scalar_lea.vmem %s544_s8, 16  ;;  %s840_s10 = scalar_lea.vmem %s544_s8, 32 }
  0x36   :  { %814 = vmatprep.subr.bf16.mxu1 %v813_v31  ;;  %v138_v44 = vld [vmem:[%s1324_s1 + $0x358] sm:$0xff]  ;;  %v156_v48 = vld [vmem:[%s1324_s1 + $0x3e8] sm:$0xff]  ;;  %v787_v49 = vpack.c.bf16 %v106_v41, %v105_v40  ;;  %v107_v52 = vld [vmem:[%s1324_s1 + $0x260] sm:$0xff]  ;;  %v454_v31 = vlaneseq  ;;  %p837_p0 = scmp.ne.s32.totalorder %s544_s8, %s836_s9  ;;  %p841_p1 = scmp.lt.s32.totalorder %s544_s8, %s544_s8 }
  0x37   :  { %784 = vmatpush3.bf16.msra.mxu0 %v783_v37  ;;  %v819_v50 = vpack.c.bf16 %v138_v44, %v137_v42  ;;  %v108_v53 = vld [vmem:[%s1324_s1 + $0x268] sm:$0xff]  ;;  %v139_v54 = vld [vmem:[%s1324_s1 + $0x360] sm:$0xff]  ;;  %v821_v55 = vpack.c.bf16 %v156_v48, %v155_v47  ;;  %v125_v57 = vld [vmem:[%s1324_s1 + $0x2f0] sm:$0xff]  ;;  %p842_p2 = scmp.lt.s32.totalorder %s840_s10, %s836_s9 }
  0x38   :  { %786 = vmatprep.subr.bf16.mxu0 %v785_v39  ;;  %v140_v56 = vld [vmem:[%s1324_s1 + $0x368] sm:$0xff]  ;;  %v126_v58 = vld [vmem:[%s1324_s1 + $0x2f8] sm:$0xff]  ;;  %v157_v59 = vld [vmem:[%s1324_s1 + $0x3f0] sm:$0xff]  ;;  %v791_v61 = vpack.c.bf16 %v108_v53, %v107_v52  ;;  %v455_v32 = vshrl.u32 %v454_v31, 7 }
  0x39   :  { %816 = vmatpush3.bf16.msra.mxu1 %v815_v38  ;;  %v158_v60 = vld [vmem:[%s1324_s1 + $0x3f8] sm:$0xff]  ;;  %v823_v62 = vpack.c.bf16 %v140_v56, %v139_v54  ;;  %v793_v63 = vpack.c.bf16 %v126_v58, %v125_v57  ;;  %v109_v0 = vld [vmem:[%s1324_s1 + $0x270] sm:$0xff]  ;;  %v27_v7 = vld [vmem:[%s1323_s0 + $0x20] sm:$0xff]  ;;  %p843_p3 = por %p842_p2, %p841_p1 }
  0x3a   :  { %818 = vmatprep.subr.bf16.mxu1 %v817_v43  ;;  %v110_v1 = vld [vmem:[%s1324_s1 + $0x278] sm:$0xff]  ;;  %v825_v2 = vpack.c.bf16 %v158_v60, %v157_v59  ;;  %v141_v3 = vld [vmem:[%s1324_s1 + $0x370] sm:$0xff]  ;;  %v448_v10 = vld [vmem:[#allocation2] sm:$0x1]  ;;  %v456_v33 = vsub.s32 0, %v455_v32 }
  0x3b   :  { %788 = vmatpush3.bf16.msra.mxu0 %v787_v49  ;;  %v142_v4 = vld [vmem:[%s1324_s1 + $0x378] sm:$0xff]  ;;  %v795_v5 = vpack.c.bf16 %v110_v1, %v109_v0  ;;  %v29_v8 = vld [vmem:[%s1323_s0 + $0x30] sm:$0xff]  ;;  %451 = vperm.xlu0 %833, %v448_v10   ;;  %v551_v13 = vld [vmem:[%s1325_s2] ss:$0 sm:$0xff]  ;;  %p844_p4 = pnand %p843_p3, %p837_p0 }
  0x3c   :  { %790 = vmatprep.subr.bf16.mxu0 %v789_v51  ;;  %v827_v6 = vpack.c.bf16 %v142_v4, %v141_v3  ;;  %v447_v30 = vld [vmem:[%s1326_s3] sm:$0x1] }
  0x3d   :  { %820 = vmatpush3.bf16.msra.mxu1 %v819_v50 }
  0x3e   :  { %822 = vmatprep.subr.bf16.mxu1 %v821_v55 }
  0x3f   :  { %792 = vmatpush3.bf16.msra.mxu0 %v791_v61 }
  0x40   :  { %794 = vmatprep.subr.bf16.mxu0 %v793_v63 }
  0x41   :  { %824 = vmatpush3.bf16.msra.mxu1 %v823_v62 }
  0x42   :  { %826 = vmatprep.subr.bf16.mxu1 %v825_v2 }
  0x43   :  { %796 = vmatpush3.bf16.msra.mxu0 %v795_v5 }
  0x44   :  { %696 = vmatprep.subr.mxu0 %v860_v9 }
  0x45   :  { %828 = vmatpush3.bf16.msra.mxu1 %v827_v6 }
  0x46   :  { %371 = vmatmul.mubr.f32.vlgmr.msra.gmra.mrb[2].mxu0 %v27_v7 }
  0x47   :  { %698 = vmatprep.mubr.msk.f32.mxu0 %vm861_vm0, %v860_v9 }
  0x48   :  { %441 = vmatmul.mubr.f32.vlgmr.msra.gmra.mrb[2].mxu1 %v29_v8 }
  0xba   :  { %v452_v34 = vpop.permute.xlu0 %451 }
  0xbb   :  { %v457_v35 = vrot.slane %v452_v34, %v456_v33 }
  0xf9   :  { %v586_v12 = vpop.f32.mrb[0].mxu0 }
  0xfa   :  { %v587_v14 = vpop.f32.mrb[1].mxu0 }
  0xfb   :  { %v621_v15 = vpop.f32.mrb[0].mxu1  ;;  %v588_v16 = vadd.f32 %v587_v14, %v586_v12 }
  0xfc   :  { %v622_v17 = vpop.f32.mrb[1].mxu1 }
  0xfd   :  { %v623_v18 = vadd.f32 %v622_v17, %v621_v15  ;;  %v233_v19 = vadd.f32 %v588_v16, %v551_v13 }
  0xff   :  { %v303_v20 = vadd.f32 %v623_v18, %v233_v19 }
 0x119   :  { %v656_v21 = vpop.f32.mrb[2].mxu0 }
 0x11a   :  { %v657_v22 = vpop.f32.mrb[3].mxu0 }
 0x11b   :  { %v691_v23 = vpop.f32.mrb[2].mxu1  ;;  %v658_v24 = vadd.f32 %v657_v22, %v656_v21 }
 0x11c   :  { %v692_v25 = vpop.f32.mrb[3].mxu1 }
 0x11d   :  { %v693_v26 = vadd.f32 %v692_v25, %v691_v23  ;;  %v373_v27 = vadd.f32 %v658_v24, %v303_v20 }
 0x11f   :  { %v443_v28 = vadd.f32 %v693_v26, %v373_v27 }
 0x121   :  { %834 = vtanh.f32 %v443_v28 }
 0x12b   :  { %v835_v29 = vpop.eup %834 }
 0x12c   :  { %697 = vmatpush3.xpose.msk.msra.mxu0 %vm458_vm1, %v835_v29 }
 0x12f   :  { %699 = vmatmul.mubr.msk.f32.vlgmr.msra.gmra.mrb[4].mxu0 %vm458_vm1, %v447_v30 }
 0x202   :  { %v531_v36 = vpop.f32.mrb[4].mxu0 }
 0x203   :  { %v532_v37 = vadd.f32 %v531_v36, %v457_v35  ;;  %v700_v38 = vpop.f32.mrb[5].mxu0 }
 0x205   :  { %536 = vst.msk [vmem:[#allocation3] sm:$0x1] %vm535_vm2, %v532_v37 }
 0x206   :  { %847 = shalt.err (!%p844_p4)
}
 0x207   :  { %s848_s12 = scalar_lea.hbm %s1328_s5, 16 }
 0x208   :  { %p849_p5 = scmp.ne.s32.totalorder %s1328_s5, %s848_s12  ;;  %p852_p6 = scmp.lt.u32.totalorder %s848_s12, %s1328_s5 }
 0x20a   :  { %p854_p7 = pnand %p852_p6, %p849_p5 }
 0x20c   :  { %857 = shalt.err (!%p854_p7)
}
 0x20d   :  { %546 = dma.vmem_to_hbm [thread:$0]  %s544_s8, 16, %s1328_s5, [#allocation4]  }
 0x20e   :  { %858 = dma.done.wait [#allocation4], 16  }
 0x20f   :  { %859 = vsyncadd [#allocation4], 4294967280 }
 0x210   :  { %550 = vsyncpa [#allocation4], 1 }

</bundles_post_ra>
